<compile_context>
chip_gen: v6e
topology: v6e:2x2x1
jax: 0.10.0
libtpu: 0.0.40
codegen_flags: <defaults>
</compile_context>

<pallas_src>
import functools

import jax
import jax.numpy as jnp
from jax.experimental import pallas as pl
from jax.experimental.pallas import tpu as pltpu


def _actor_critic_kernel(x_ref, w1_ref, b1_ref, w2_ref, b2_ref, w3_ref, b3_ref,
                         out_ref, *, fc1_elementwise):
    x = x_ref[...].astype(jnp.float32)
    b1 = b1_ref[...].astype(jnp.float32)

    if fc1_elementwise:
        # num_features == 1: fc1 is an outer product. A single VPU broadcast
        # multiply per vreg — keeps the MXU free and avoids K=1 fill/drain.
        h1 = x * w1_ref[...].astype(jnp.float32) + b1      # (bb,1)*(1,H)->(bb,H)
    else:
        h1 = jnp.dot(x.astype(w1_ref.dtype), w1_ref[...],
                     preferred_element_type=jnp.float32) + b1
    h1 = jnp.maximum(h1, 0.0)
    # dropout(p=0.25): identity in inference mode.
    # TODO(synk): add pltpu.prng_seed/prng_random_bits masking for training mode.

    # fc2 + ReLU (bf16 MXU operands, f32 accumulation, f32 bias/ReLU on VPU)
    h2 = jnp.dot(h1.astype(w2_ref.dtype), w2_ref[...],
                 preferred_element_type=jnp.float32)
    h2 = jnp.maximum(h2 + b2_ref[...].astype(jnp.float32), 0.0)

    # state_action_head (no activation); output lanes are padded to 128.
    out = jnp.dot(h2.astype(w3_ref.dtype), w3_ref[...],
                  preferred_element_type=jnp.float32)
    out_ref[...] = (out + b3_ref[...].astype(jnp.float32)).astype(out_ref.dtype)


@functools.partial(jax.jit, static_argnames=("block_b", "mxu_dtype"))
def actor_critic_forward(x, params, block_b=None, mxu_dtype=jnp.bfloat16):
    """x: [B, num_features] float32. Returns [B, num_actions] float32."""
    w1, b1, w2, b2, w3, b3 = params
    B, F = x.shape
    H = w1.shape[1]
    H2 = w2.shape[1]
    A = w3.shape[1]

    # Batch tiling: whole batch in one grid step when small; 128-row tiles
    # otherwise (enough rows per step for the MXU and for v7x megacore).
    if block_b is None:
        block_b = B if B <= 128 else 128
    grid_b = pl.cdiv(B, block_b)
    b_pad = grid_b * block_b

    # Lane-dense output: pad the head to a multiple of 128 lanes so stores are
    # full vst (not masked vst.msk); wrapper slices the valid columns back out.
    a_pad = pl.cdiv(A, 128) * 128

    x_p = jnp.pad(x, ((0, b_pad - B), (0, 0))) if b_pad != B else x
    w3_p = jnp.pad(w3, ((0, 0), (0, a_pad - A)))
    b3_p = jnp.pad(b3, ((0, 0), (0, a_pad - A)))

    fc1_elementwise = (F == 1)
    # bf16 MXU operands; biases (VPU adds) stay f32; fc1 weight stays f32 when
    # it is used on the VPU path.
    w1_c = w1.astype(jnp.float32) if fc1_elementwise else w1.astype(mxu_dtype)
    w2_c = w2.astype(mxu_dtype)
    w3_c = w3_p.astype(mxu_dtype)

    # Weight/bias blocks are grid-invariant: single-buffer them when the grid
    # actually iterates (saves 2x VMEM + redundant DMA descriptors).
    multi_step = grid_b > 1

    def const_spec(shape):
        if multi_step:
            return pl.BlockSpec(shape, lambda i: (0, 0),
                                pipeline_mode=pl.Buffered(1))
        return pl.BlockSpec(shape, lambda i: (0, 0))

    kernel = functools.partial(_actor_critic_kernel,
                               fc1_elementwise=fc1_elementwise)

    out = pl.pallas_call(
        kernel,
        out_shape=jax.ShapeDtypeStruct((b_pad, a_pad), jnp.float32),
        grid=(grid_b,),
        in_specs=[
            pl.BlockSpec((block_b, F), lambda i: (i, 0)),   # x tile
            const_spec((F, H)),     # w1
            const_spec((1, H)),     # b1
            const_spec((H, H2)),    # w2
            const_spec((1, H2)),    # b2
            const_spec((H2, a_pad)),  # w3 (lane-padded)
            const_spec((1, a_pad)),   # b3 (lane-padded)
        ],
        out_specs=pl.BlockSpec((block_b, a_pad), lambda i: (i, 0)),
        compiler_params=pltpu.CompilerParams(
            dimension_semantics=("parallel",)),
    )(x_p, w1_c, b1, w2_c, b2, w3_c, b3_p)

    return out[:B, :A]


def init_params(key, num_features, hidden_size, num_actions):
    """PyTorch nn.Linear default init (U[-1/sqrt(fan_in), 1/sqrt(fan_in)]).

    Weights are stored as [in, out] (transposed vs. PyTorch's [out, in]).
    """
    h2 = hidden_size // 2
    dims = [(num_features, hidden_size), (hidden_size, h2), (h2, num_actions)]
    params = []
    for fan_in, fan_out in dims:
        key, kw, kb = jax.random.split(key, 3)
        bound = 1.0 / (fan_in ** 0.5)
        w = jax.random.uniform(kw, (fan_in, fan_out), jnp.float32, -bound, bound)
        b = jax.random.uniform(kb, (1, fan_out), jnp.float32, -bound, bound)
        params += [w, b]
    return tuple(params)


def reference_forward(x, params, mxu_dtype=None):
    """Pure-JAX reference of the PyTorch forward (dropout in eval mode).

    mxu_dtype=None  -> full-precision f32 reference of the PyTorch module.
    mxu_dtype=bf16  -> mimics the kernel's mixed precision (bf16 MXU operands,
                       f32 accumulation / elementwise) for a tight check.
    """
    w1, b1, w2, b2, w3, b3 = params
    hi = jax.lax.Precision.HIGHEST
    c = (lambda a: a) if mxu_dtype is None else (lambda a: a.astype(mxu_dtype))
    if x.shape[1] == 1:
        # Outer product; mathematically identical to x @ w1, matches the
        # kernel's f32 VPU path exactly.
        h1 = x * w1 + b1
    else:
        h1 = jnp.dot(c(x), c(w1), precision=hi,
                     preferred_element_type=jnp.float32) + b1
    h1 = jnp.maximum(h1, 0.0)
    h2 = jnp.maximum(jnp.dot(c(h1), c(w2), precision=hi,
                             preferred_element_type=jnp.float32) + b2, 0.0)
    return jnp.dot(c(h2), c(w3), precision=hi,
                   preferred_element_type=jnp.float32) + b3


if __name__ == "__main__":
    # Shapes consistent with the module: num_features=1 (scalar state),
    # hidden_size=32, num_actions=8, batch=16.
    num_features = 1
    hidden_size = 32
    num_actions = 8
    batch = 16

    key = jax.random.PRNGKey(0)
    key, kx = jax.random.split(key)
    x = jax.random.normal(kx, (batch, num_features), jnp.float32)
    params = init_params(key, num_features, hidden_size, num_actions)

    out = actor_critic_forward(x, params)
    out = jax.block_until_ready(out)
    assert out.shape == (batch, num_actions)

    # Tight check vs a reference that mimics the kernel's mixed precision.
    ref_mimic = reference_forward(x, params, mxu_dtype=jnp.bfloat16)
    assert jnp.allclose(out, ref_mimic, atol=2e-3, rtol=2e-3), \
        "mismatch vs bf16-mimic reference"

    # Loose check vs the full-f32 PyTorch-semantics reference.
    ref_f32 = reference_forward(x, params)
    assert jnp.allclose(out, ref_f32, atol=1e-1, rtol=1e-1), \
        "mismatch vs f32 reference"

    print("KERNEL_OK")
</pallas_src>

<mosaic_0001>
module attributes {stable_mosaic.version = 11 : i64} {
  func.func @_actor_critic_kernel(%arg0: i32, %arg1: memref<16x1xf32, #tpu.memory_space<vmem>>, %arg2: memref<1x32xf32, #tpu.memory_space<vmem>>, %arg3: memref<1x32xf32, #tpu.memory_space<vmem>>, %arg4: memref<32x16xbf16, #tpu.memory_space<vmem>>, %arg5: memref<1x16xf32, #tpu.memory_space<vmem>>, %arg6: memref<16x128xbf16, #tpu.memory_space<vmem>>, %arg7: memref<1x128xf32, #tpu.memory_space<vmem>>, %arg8: memref<16x128xf32, #tpu.memory_space<vmem>>) attributes {dimension_semantics = [#tpu.dimension_semantics<parallel>], iteration_bounds = array<i64: 1>, scalar_prefetch = 0 : i64, scratch_operands = 0 : i64, tpu.core_type = #tpu.core_type<tc>, window_params = [{transform_indices = @transform_0, window_bounds = array<i64: 16, 1>}, {pipeline_mode = #tpu.pipeline_mode<synchronous>, transform_indices = @transform_1, window_bounds = array<i64: 1, 32>}, {pipeline_mode = #tpu.pipeline_mode<synchronous>, transform_indices = @transform_2, window_bounds = array<i64: 1, 32>}, {pipeline_mode = #tpu.pipeline_mode<synchronous>, transform_indices = @transform_3, window_bounds = array<i64: 32, 16>}, {pipeline_mode = #tpu.pipeline_mode<synchronous>, transform_indices = @transform_4, window_bounds = array<i64: 1, 16>}, {pipeline_mode = #tpu.pipeline_mode<synchronous>, transform_indices = @transform_5, window_bounds = array<i64: 16, 128>}, {pipeline_mode = #tpu.pipeline_mode<synchronous>, transform_indices = @transform_6, window_bounds = array<i64: 1, 128>}, {transform_indices = @transform_7, window_bounds = array<i64: 16, 128>}]} {
    %c0 = arith.constant 0 : index
    %c0_0 = arith.constant 0 : index
    %0 = vector.load %arg1[%c0, %c0_0] : memref<16x1xf32, #tpu.memory_space<vmem>>, vector<16x1xf32>
    %c0_1 = arith.constant 0 : index
    %c0_2 = arith.constant 0 : index
    %1 = vector.load %arg3[%c0_1, %c0_2] : memref<1x32xf32, #tpu.memory_space<vmem>>, vector<1x32xf32>
    %c0_3 = arith.constant 0 : index
    %c0_4 = arith.constant 0 : index
    %2 = vector.load %arg2[%c0_3, %c0_4] : memref<1x32xf32, #tpu.memory_space<vmem>>, vector<1x32xf32>
    %3 = vector.broadcast %0 : vector<16x1xf32> to vector<16x32xf32>
    %4 = vector.broadcast %2 : vector<1x32xf32> to vector<16x32xf32>
    %5 = arith.mulf %3, %4 : vector<16x32xf32>
    %6 = vector.broadcast %1 : vector<1x32xf32> to vector<16x32xf32>
    %7 = arith.addf %5, %6 : vector<16x32xf32>
    %cst = arith.constant 0.000000e+00 : f32
    %8 = vector.broadcast %cst : f32 to vector<16x32xf32>
    %9 = arith.maximumf %7, %8 : vector<16x32xf32>
    %10 = arith.truncf %9 : vector<16x32xf32> to vector<16x32xbf16>
    %c0_5 = arith.constant 0 : index
    %c0_6 = arith.constant 0 : index
    %11 = vector.load %arg4[%c0_5, %c0_6] : memref<32x16xbf16, #tpu.memory_space<vmem>>, vector<32x16xbf16>
    %cst_7 = arith.constant dense<0.000000e+00> : vector<16x16xf32>
    %12 = tpu.matmul %10, %11, %cst_7 {dimension_numbers = #tpu.dot_dimension_numbers<[1], [0], [0], [1], [0, 0, 1, 1], [], []>} : vector<16x32xbf16>, vector<32x16xbf16>, vector<16x16xf32> -> vector<16x16xf32>
    %c0_8 = arith.constant 0 : index
    %c0_9 = arith.constant 0 : index
    %13 = vector.load %arg5[%c0_8, %c0_9] : memref<1x16xf32, #tpu.memory_space<vmem>>, vector<1x16xf32>
    %14 = vector.broadcast %13 : vector<1x16xf32> to vector<16x16xf32>
    %15 = arith.addf %12, %14 : vector<16x16xf32>
    %cst_10 = arith.constant 0.000000e+00 : f32
    %16 = vector.broadcast %cst_10 : f32 to vector<16x16xf32>
    %17 = arith.maximumf %15, %16 : vector<16x16xf32>
    %18 = arith.truncf %17 : vector<16x16xf32> to vector<16x16xbf16>
    %c0_11 = arith.constant 0 : index
    %c0_12 = arith.constant 0 : index
    %19 = vector.load %arg6[%c0_11, %c0_12] : memref<16x128xbf16, #tpu.memory_space<vmem>>, vector<16x128xbf16>
    %cst_13 = arith.constant dense<0.000000e+00> : vector<16x128xf32>
    %20 = tpu.matmul %18, %19, %cst_13 {dimension_numbers = #tpu.dot_dimension_numbers<[1], [0], [0], [1], [0, 0, 1, 1], [], []>} : vector<16x16xbf16>, vector<16x128xbf16>, vector<16x128xf32> -> vector<16x128xf32>
    %c0_14 = arith.constant 0 : index
    %c0_15 = arith.constant 0 : index
    %21 = vector.load %arg7[%c0_14, %c0_15] : memref<1x128xf32, #tpu.memory_space<vmem>>, vector<1x128xf32>
    %22 = vector.broadcast %21 : vector<1x128xf32> to vector<16x128xf32>
    %23 = arith.addf %20, %22 : vector<16x128xf32>
    %c0_16 = arith.constant 0 : index
    %c0_17 = arith.constant 0 : index
    %24 = vector.load %arg8[%c0_16, %c0_17] : memref<16x128xf32, #tpu.memory_space<vmem>>, vector<16x128xf32>
    tpu.vector_store %arg8[%c0_16, %c0_17], %23 {strides = array<i32>} : memref<16x128xf32, #tpu.memory_space<vmem>>, vector<16x128xf32>,
    return
  }
  func.func @transform_0(%arg0: i32) -> (i32, i32) {
    %c0_i32 = arith.constant 0 : i32
    %c0_i32_0 = arith.constant 0 : i32
    return %arg0, %c0_i32 : i32, i32
  }
  func.func @transform_1(%arg0: i32) -> (i32, i32) {
    %c0_i32 = arith.constant 0 : i32
    %c0_i32_0 = arith.constant 0 : i32
    %c0_i32_1 = arith.constant 0 : i32
    return %c0_i32, %c0_i32_0 : i32, i32
  }
  func.func @transform_2(%arg0: i32) -> (i32, i32) {
    %c0_i32 = arith.constant 0 : i32
    %c0_i32_0 = arith.constant 0 : i32
    %c0_i32_1 = arith.constant 0 : i32
    return %c0_i32, %c0_i32_0 : i32, i32
  }
  func.func @transform_3(%arg0: i32) -> (i32, i32) {
    %c0_i32 = arith.constant 0 : i32
    %c0_i32_0 = arith.constant 0 : i32
    %c0_i32_1 = arith.constant 0 : i32
    return %c0_i32, %c0_i32_0 : i32, i32
  }
  func.func @transform_4(%arg0: i32) -> (i32, i32) {
    %c0_i32 = arith.constant 0 : i32
    %c0_i32_0 = arith.constant 0 : i32
    %c0_i32_1 = arith.constant 0 : i32
    return %c0_i32, %c0_i32_0 : i32, i32
  }
  func.func @transform_5(%arg0: i32) -> (i32, i32) {
    %c0_i32 = arith.constant 0 : i32
    %c0_i32_0 = arith.constant 0 : i32
    %c0_i32_1 = arith.constant 0 : i32
    return %c0_i32, %c0_i32_0 : i32, i32
  }
  func.func @transform_6(%arg0: i32) -> (i32, i32) {
    %c0_i32 = arith.constant 0 : i32
    %c0_i32_0 = arith.constant 0 : i32
    %c0_i32_1 = arith.constant 0 : i32
    return %c0_i32, %c0_i32_0 : i32, i32
  }
  func.func @transform_7(%arg0: i32) -> (i32, i32) {
    %c0_i32 = arith.constant 0 : i32
    %c0_i32_0 = arith.constant 0 : i32
    return %arg0, %c0_i32 : i32, i32
  }
}

</mosaic_0001>

<bundles_post_ra>
// kernel: actor_critic_forward.1
= control target key start
LH: loop header
LB: loop body
LE: loop exit
PB: predicated region body
PF: predicated region fallthrough
CT: control target
= control target key end

     0   :  { %v232_v0 = vmov 0   ;;  %v233_v3 = vmov 0.0   ;;  %vm234_vm0 = vmmov 0   ;;  %vm83_vm1 = vcmask 261120   ;;  %s308_s0 = inlined_call_operand.vmem [shape: f32[16,1], index: 0, kind: input, shape index: {}]   ;;  %s309_s3 = inlined_call_operand.vmem [shape: bf16[32,16], index: 3, kind: input, shape index: {}]   ;;  %s310_s1 = inlined_call_operand.vmem [shape: f32[1,32], index: 1, kind: input, shape index: {}]   ;;  %s311_s2 = inlined_call_operand.vmem [shape: f32[1,32], index: 2, kind: input, shape index: {}]   ;;  %s312_s5 = inlined_call_operand.vmem [shape: bf16[16,128], index: 5, kind: input, shape index: {}]   ;;  %s313_s4 = inlined_call_operand.vmem [shape: f32[1,16], index: 4, kind: input, shape index: {}]   ;;  %s314_s6 = inlined_call_operand.vmem [shape: f32[1,128], index: 6, kind: input, shape index: {}]   ;;  %s315_s7 = inlined_call_operand.vmem [shape: f32[16,128], index: 7, kind: output, shape index: {}]  }
   0x1   :  { %228 = vset.pattern.permute.xlu0 %v232_v0  ;;  %v27_v1 = vld [vmem:[%s308_s0] sm:$0xff]  ;;  %v28_v2 = vld [vmem:[%s308_s0 + $0x8] sm:$0xff]  ;;  %211 = vmatprep.subr.bf16.mxu0 %v233_v3  ;;  %vm146_vm2 = vcmask 130048  }
   0x2   :  { %33 = vperm.xlu0 %228, %v27_v1   ;;  %v229_v4 = vld [vmem:[%s309_s3 + $0x8] sm:$0xff]   ;;  %219 = vmatprep.subr.bf16.mxu1 %v233_v3  ;;  %v230_v5 = vld [vmem:[%s309_s3] sm:$0xff]  }
   0x3   :  { %212 = vmatpush3.bf16.msra.mxu0 %v229_v4  ;;  %215 = vmatprep.mubr.msk.bf16.mxu0 %vm234_vm0, %v233_v3  ;;  %v197_v6 = vld [vmem:[%s310_s1] ss:$0 sm:$0xff] }
   0x4   :  { %213 = vmatprep.subr.bf16.mxu0 %v233_v3  ;;  %221 = vmatprep.mubr.msk.bf16.mxu1 %vm234_vm0, %v233_v3  ;;  %v198_v9 = vld [vmem:[%s311_s2] ss:$0 sm:$0xff] }
   0x5   :  { %v231_v17 = vld [vmem:[%s312_s5] sm:$0xff]  }
   0x6   :  { %38 = vperm.xlu0 %228, %v28_v2   ;;  %220 = vmatpush3.bf16.msra.mxu1 %v231_v17  ;;  %v199_v18 = vld [vmem:[%s313_s4] ss:$0 sm:$0xff] }
   0x7   :  { %214 = vmatpush3.bf16.msra.mxu0 %v230_v5  ;;  %v203_v28 = vld [vmem:[%s314_s6] ss:$0 sm:$0xff] }
  0x7d   :  { %v34_v7 = vpop.permute.xlu0 %33 }
  0x7e   :  { %v47_v8 = vmul.f32 %v197_v6, %v34_v7 }
  0x80   :  { %v55_v11 = vadd.f32 %v198_v9, %v47_v8 }
  0x81   :  { %v39_v10 = vpop.permute.xlu0 %38 }
  0x82   :  { %v48_v12 = vmul.f32 %v197_v6, %v39_v10  ;;  %v57_v14 = vmax.f32 %v55_v11, 0.0 }
  0x84   :  { %v56_v13 = vadd.f32 %v198_v9, %v48_v12 }
  0x86   :  { %v58_v15 = vmax.f32 %v56_v13, 0.0 }
  0x88   :  { %v59_v16 = vpack.c.bf16 %v58_v15, %v57_v14 }
  0x8a   :  { %216 = vmatmul.mubr.msk.bf16.vlgmr.msra.gmra.mxu0 %vm83_vm1, %v59_v16 }
 0x14a   :  { %v121_v19 = vpop.f32.mrf.mxu0 }
 0x14b   :  { %v122_v21 = vadd.f32 %v199_v18, %v121_v19 }
 0x14c   :  { %v217_v20 = vpop.f32.mrf.mxu0 }
 0x14d   :  { %v128_v25 = vmax.f32 %v122_v21, 0.0 }
 0x14e   :  { %v124_v22 = vpop.f32.mrf.mxu0 }
 0x14f   :  { %v125_v23 = vadd.f32 %v199_v18, %v124_v22 }
 0x150   :  { %v218_v24 = vpop.f32.mrf.mxu0 }
 0x151   :  { %v129_v26 = vmax.f32 %v125_v23, 0.0 }
 0x153   :  { %v130_v27 = vpack.c.bf16 %v129_v26, %v128_v25 }
 0x155   :  { %222 = vmatmul.mubr.msk.bf16.vlgmr.msra.gmra.mxu1 %vm146_vm2, %v130_v27 }
 0x215   :  { %v184_v29 = vpop.f32.mrf.mxu1 }
 0x216   :  { %v185_v30 = vadd.f32 %v203_v28, %v184_v29 }
 0x217   :  { %v223_v31 = vpop.f32.mrf.mxu1 }
 0x218   :  { %191 = vst [vmem:[%s315_s7] sm:$0xff] %v185_v30 }
 0x219   :  { %v187_v32 = vpop.f32.mrf.mxu1 }
 0x21a   :  { %v188_v33 = vadd.f32 %v203_v28, %v187_v32 }
 0x21b   :  { %v224_v34 = vpop.f32.mrf.mxu1 }
 0x21c   :  { %192 = vst [vmem:[%s315_s7 + $0x8] sm:$0xff] %v188_v33 }

</bundles_post_ra>
